<compile_context>
chip_gen: v6e
topology: v6e:2x2x1
jax: 0.10.0
libtpu: 0.0.40
codegen_flags: <defaults>
</compile_context>

<pallas_src>
import functools

import jax
import jax.numpy as jnp
from jax.experimental import pallas as pl
from jax.experimental.pallas import tpu as pltpu


LANE = 128                        # TPU lane width (weight/bias lane padding)
_TM_MAX = 2048                    # max token-tile rows per grid step
_VMEM_BUDGET_BYTES = 24 * 1024 * 1024   # headroom under the 32 MiB scoped limit


def _round_up(x, m):
    return ((x + m - 1) // m) * m


def _cdiv(a, b):
    return -(-a // b)


def _choose_tm(T, H, tm_max=_TM_MAX):
    """Token-tile rows.

    - multiple of 16 (bf16 sublane packing) unless a single full-dim tile
    - VMEM-aware cap: ~18 B/row/col covers the double-buffered bf16 input, the
      f32 layernorm temporaries, the bf16 normalized copy and the f32 MXU
      accumulator, so the same tiling also fits v7x's smaller VMEM as H grows
    - even step count when tiling so v7x's two TensorCores share the grid
    """
    bytes_per_row = 18 * H + 4 * LANE
    vmem_rows = max(16, _VMEM_BUDGET_BYTES // bytes_per_row)
    tm_cap = max(16, min(tm_max, (vmem_rows // 16) * 16))
    if T <= 32:
        return T                                   # single full-dim tile
    if T <= tm_cap:
        return min(_round_up(_cdiv(T, 2), 16), tm_cap)   # 2 even-ish tiles
    n = _cdiv(T, tm_cap)
    if n % 2 == 1:
        n += 1
    return max(16, min(_round_up(_cdiv(T, n), 16), tm_cap))


# ----------------------------- Pallas kernel ------------------------------- #

def _probe_kernel(x_ref, m_ref, w_ref, b_ref, o_ref):
    # x_ref: (tm, H)  bf16 raw hidden tile (pre-mask, pre-layernorm)
    # m_ref: (tm, 1)  f32  attention mask column
    # w_ref: (H, LP)  bf16 lane-padded probe weight (grid-resident)
    # b_ref: (1, LP)  f32  lane-padded probe bias   (grid-resident)
    # o_ref: (tm, L)  f32  probe output (L = num_labels, un-padded)
    L = o_ref.shape[-1]
    x = x_ref[...].astype(jnp.float32) * m_ref[...]          # mask gating (VPU)
    inv_h = 1.0 / x.shape[-1]
    mu = jnp.sum(x, axis=-1, keepdims=True) * inv_h           # single-pass LN stats
    ex2 = jnp.sum(x * x, axis=-1, keepdims=True) * inv_h
    var = jnp.maximum(ex2 - mu * mu, 0.0)
    xn = ((x - mu) * jax.lax.rsqrt(var + 1e-5)).astype(jnp.bfloat16)
    acc = jnp.dot(xn, w_ref[...], preferred_element_type=jnp.float32)   # MXU
    o_ref[...] = (acc + b_ref[...])[:, :L]                    # narrow store, tiny bytes


@functools.partial(jax.jit, static_argnames=("num_labels",))
def probe_pallas(x_bf16, mask_f32, w_pad, b_pad, *, num_labels):
    """Fused mask + layernorm + linear probe.

    x_bf16:   [T, H]  bf16 raw hidden states
    mask_f32: [T, 1]  f32 attention mask
    w_pad:    [H, LP] bf16 lane-padded probe weight (LP multiple of 128)
    b_pad:    [1, LP] f32  lane-padded probe bias
    returns:  [T, num_labels] f32
    """
    T, H = x_bf16.shape
    LP = w_pad.shape[1]
    tm = _choose_tm(T, H)
    grid = _cdiv(T, tm)

    return pl.pallas_call(
        _probe_kernel,
        out_shape=jax.ShapeDtypeStruct((T, num_labels), jnp.float32),
        grid_spec=pltpu.PrefetchScalarGridSpec(
            num_scalar_prefetch=0,
            grid=(grid,),
            in_specs=[
                pl.BlockSpec((tm, H), lambda i: (i, 0)),     # token tile
                pl.BlockSpec((tm, 1), lambda i: (i, 0)),     # mask tile
                pl.BlockSpec((H, LP), lambda i: (0, 0)),     # probe weight (resident)
                pl.BlockSpec((1, LP), lambda i: (0, 0)),     # probe bias   (resident)
            ],
            out_specs=pl.BlockSpec((tm, num_labels), lambda i: (i, 0)),
        ),
        compiler_params=pltpu.CompilerParams(
            dimension_semantics=("parallel",),
            vmem_limit_bytes=32 * 1024 * 1024,
        ),
    )(x_bf16, mask_f32, w_pad, b_pad)


# --------------------------- ModelProbing forward --------------------------- #

def model_probing_forward(input_ids, attention_mask, emb_table, probe_w, probe_b):
    """ModelProbing.forward: synthetic frozen backbone + fused Pallas probe."""
    B, S = input_ids.shape
    H = emb_table.shape[1]
    L = probe_w.shape[1]                       # probe weight stored [H, L]
    LP = _round_up(L, LANE)

    # Embedding gather (the only non-fused backbone piece) — plain JAX glue.
    hidden = emb_table[input_ids].reshape(B * S, H).astype(jnp.bfloat16)
    mask = attention_mask.reshape(B * S, 1).astype(jnp.float32)

    # Lane-pad weight/bias so the MXU sees a full 128-wide N; the store itself
    # only writes the real L labels.
    w_pad = jnp.zeros((H, LP), jnp.bfloat16).at[:, :L].set(probe_w.astype(jnp.bfloat16))
    b_pad = jnp.zeros((1, LP), jnp.float32).at[:, :L].set(probe_b.astype(jnp.float32))

    out = probe_pallas(hidden, mask, w_pad, b_pad, num_labels=L)   # [B*S, L] f32
    return out.reshape(B, S, L)


# ------------------------------- reference ---------------------------------- #

def reference_forward(input_ids, attention_mask, emb_table, probe_w, probe_b):
    """Pure-JAX reference, mimicking the kernel's bf16 input quantization."""
    h = emb_table[input_ids].astype(jnp.bfloat16).astype(jnp.float32)       # [B,S,H]
    h = h * attention_mask[..., None].astype(jnp.float32)
    mu = jnp.mean(h, axis=-1, keepdims=True)
    var = jnp.mean((h - mu) ** 2, axis=-1, keepdims=True)
    hn = ((h - mu) * jax.lax.rsqrt(var + 1e-5)).astype(jnp.bfloat16).astype(jnp.float32)
    w = probe_w.astype(jnp.bfloat16).astype(jnp.float32)
    return jnp.einsum("bsh,hl->bsl", hn, w,
                      precision=jax.lax.Precision.HIGHEST) + probe_b[0]


# ----------------------------------- main ----------------------------------- #

if __name__ == "__main__":
    # Small shapes consistent with the module: batch=2, seq=8, hidden=128,
    # num_labels=4, vocab=100.
    B, S, H, L, VOCAB = 2, 8, 128, 4, 100

    key = jax.random.PRNGKey(0)
    k_ids, k_emb, k_w, k_b = jax.random.split(key, 4)

    input_ids = jax.random.randint(k_ids, (B, S), 0, VOCAB, dtype=jnp.int32)
    attention_mask = jnp.ones((B, S), dtype=jnp.int32).at[:, S - 2:].set(0)  # some padding

    # Deterministic parameter init (synthetic; no checkpoint load).
    emb_table = jax.random.normal(k_emb, (VOCAB, H), dtype=jnp.float32) * 0.02
    # nn.Linear(H, L): weight [L, H], bias [L]; stored transposed as [H, L].
    probe_w = (jax.random.normal(k_w, (L, H), dtype=jnp.float32) * (1.0 / jnp.sqrt(H))).T
    probe_b = jax.random.normal(k_b, (1, L), dtype=jnp.float32) * 0.01

    fwd = jax.jit(model_probing_forward)
    out = jax.block_until_ready(fwd(input_ids, attention_mask, emb_table, probe_w, probe_b))

    ref = reference_forward(input_ids, attention_mask, emb_table, probe_w, probe_b)
    assert out.shape == (B, S, L), out.shape
    assert jnp.allclose(out, ref, atol=5e-3, rtol=5e-3), (
        f"mismatch vs reference: max abs err {jnp.max(jnp.abs(out - ref))}"
    )

    print("KERNEL_OK")
</pallas_src>

<mosaic_0001>
module attributes {stable_mosaic.version = 11 : i64} {
  func.func @_probe_kernel(%arg0: i32, %arg1: memref<16x128xbf16, #tpu.memory_space<vmem>>, %arg2: memref<16x1xf32, #tpu.memory_space<vmem>>, %arg3: memref<128x128xbf16, #tpu.memory_space<vmem>>, %arg4: memref<1x128xf32, #tpu.memory_space<vmem>>, %arg5: memref<16x4xf32, #tpu.memory_space<vmem>>) attributes {dimension_semantics = [#tpu.dimension_semantics<parallel>], iteration_bounds = array<i64: 1>, scalar_prefetch = 0 : i64, scratch_operands = 0 : i64, tpu.core_type = #tpu.core_type<tc>, window_params = [{transform_indices = @transform_0, window_bounds = array<i64: 16, 128>}, {transform_indices = @transform_1, window_bounds = array<i64: 16, 1>}, {pipeline_mode = #tpu.pipeline_mode<synchronous>, transform_indices = @transform_2, window_bounds = array<i64: 128, 128>}, {pipeline_mode = #tpu.pipeline_mode<synchronous>, transform_indices = @transform_3, window_bounds = array<i64: 1, 128>}, {transform_indices = @transform_4, window_bounds = array<i64: 16, 4>}]} {
    %c0 = arith.constant 0 : index
    %c0_0 = arith.constant 0 : index
    %0 = vector.load %arg1[%c0, %c0_0] : memref<16x128xbf16, #tpu.memory_space<vmem>>, vector<16x128xbf16>
    %1 = arith.extf %0 : vector<16x128xbf16> to vector<16x128xf32>
    %c0_1 = arith.constant 0 : index
    %c0_2 = arith.constant 0 : index
    %2 = vector.load %arg2[%c0_1, %c0_2] : memref<16x1xf32, #tpu.memory_space<vmem>>, vector<16x1xf32>
    %3 = vector.broadcast %2 : vector<16x1xf32> to vector<16x128xf32>
    %4 = arith.mulf %1, %3 : vector<16x128xf32>
    %cst = arith.constant dense<0.000000e+00> : vector<16xf32>
    %5 = vector.multi_reduction <add>, %4, %cst [1] : vector<16x128xf32> to vector<16xf32>
    %6 = vector.shape_cast %5 : vector<16xf32> to vector<16x1xf32>
    %cst_3 = arith.constant 7.812500e-03 : f32
    %7 = vector.broadcast %cst_3 : f32 to vector<16x1xf32>
    %8 = arith.mulf %6, %7 : vector<16x1xf32>
    %9 = arith.mulf %4, %4 : vector<16x128xf32>
    %cst_4 = arith.constant dense<0.000000e+00> : vector<16xf32>
    %10 = vector.multi_reduction <add>, %9, %cst_4 [1] : vector<16x128xf32> to vector<16xf32>
    %11 = vector.shape_cast %10 : vector<16xf32> to vector<16x1xf32>
    %cst_5 = arith.constant 7.812500e-03 : f32
    %12 = vector.broadcast %cst_5 : f32 to vector<16x1xf32>
    %13 = arith.mulf %11, %12 : vector<16x1xf32>
    %14 = arith.mulf %8, %8 : vector<16x1xf32>
    %15 = arith.subf %13, %14 : vector<16x1xf32>
    %cst_6 = arith.constant 0.000000e+00 : f32
    %16 = vector.broadcast %cst_6 : f32 to vector<16x1xf32>
    %17 = arith.maximumf %15, %16 : vector<16x1xf32>
    %18 = vector.broadcast %8 : vector<16x1xf32> to vector<16x128xf32>
    %19 = arith.subf %4, %18 : vector<16x128xf32>
    %cst_7 = arith.constant 9.99999974E-6 : f32
    %20 = vector.broadcast %cst_7 : f32 to vector<16x1xf32>
    %21 = arith.addf %17, %20 : vector<16x1xf32>
    %22 = math.rsqrt %21 : vector<16x1xf32>
    %23 = vector.broadcast %22 : vector<16x1xf32> to vector<16x128xf32>
    %24 = arith.mulf %19, %23 : vector<16x128xf32>
    %25 = arith.truncf %24 : vector<16x128xf32> to vector<16x128xbf16>
    %c0_8 = arith.constant 0 : index
    %c0_9 = arith.constant 0 : index
    %26 = vector.load %arg3[%c0_8, %c0_9] : memref<128x128xbf16, #tpu.memory_space<vmem>>, vector<128x128xbf16>
    %cst_10 = arith.constant dense<0.000000e+00> : vector<16x128xf32>
    %27 = tpu.matmul %25, %26, %cst_10 {dimension_numbers = #tpu.dot_dimension_numbers<[1], [0], [0], [1], [0, 0, 1, 1], [], []>} : vector<16x128xbf16>, vector<128x128xbf16>, vector<16x128xf32> -> vector<16x128xf32>
    %c0_11 = arith.constant 0 : index
    %c0_12 = arith.constant 0 : index
    %28 = vector.load %arg4[%c0_11, %c0_12] : memref<1x128xf32, #tpu.memory_space<vmem>>, vector<1x128xf32>
    %29 = vector.broadcast %28 : vector<1x128xf32> to vector<16x128xf32>
    %30 = arith.addf %27, %29 : vector<16x128xf32>
    %31 = vector.extract_strided_slice %30 {offsets = [0, 0], sizes = [16, 4], strides = [1, 1]} : vector<16x128xf32> to vector<16x4xf32>
    %c0_13 = arith.constant 0 : index
    %c0_14 = arith.constant 0 : index
    %32 = vector.load %arg5[%c0_13, %c0_14] : memref<16x4xf32, #tpu.memory_space<vmem>>, vector<16x4xf32>
    tpu.vector_store %arg5[%c0_13, %c0_14], %31 {strides = array<i32>} : memref<16x4xf32, #tpu.memory_space<vmem>>, vector<16x4xf32>,
    return
  }
  func.func @transform_0(%arg0: i32) -> (i32, i32) {
    %c0_i32 = arith.constant 0 : i32
    %c0_i32_0 = arith.constant 0 : i32
    return %arg0, %c0_i32 : i32, i32
  }
  func.func @transform_1(%arg0: i32) -> (i32, i32) {
    %c0_i32 = arith.constant 0 : i32
    %c0_i32_0 = arith.constant 0 : i32
    return %arg0, %c0_i32 : i32, i32
  }
  func.func @transform_2(%arg0: i32) -> (i32, i32) {
    %c0_i32 = arith.constant 0 : i32
    %c0_i32_0 = arith.constant 0 : i32
    %c0_i32_1 = arith.constant 0 : i32
    return %c0_i32, %c0_i32_0 : i32, i32
  }
  func.func @transform_3(%arg0: i32) -> (i32, i32) {
    %c0_i32 = arith.constant 0 : i32
    %c0_i32_0 = arith.constant 0 : i32
    %c0_i32_1 = arith.constant 0 : i32
    return %c0_i32, %c0_i32_0 : i32, i32
  }
  func.func @transform_4(%arg0: i32) -> (i32, i32) {
    %c0_i32 = arith.constant 0 : i32
    %c0_i32_0 = arith.constant 0 : i32
    return %arg0, %c0_i32 : i32, i32
  }
}

</mosaic_0001>

<bundles_post_ra>
// kernel: probe_pallas.1
= control target key start
LH: loop header
LB: loop body
LE: loop exit
PB: predicated region body
PF: predicated region fallthrough
CT: control target
= control target key end

     0   :  { %9 = vsyncpa [#allocation3], 0  ;;  %s282_s15 = smov [#allocation2]   ;;  %s334_s0 = inlined_call_operand.vmem [shape: bf16[16,128], index: 0, kind: input, shape index: {}]   ;;  %s335_s1 = inlined_call_operand.vmem [shape: f32[16,1], index: 1, kind: input, shape index: {}]   ;;  %s336_s2 = inlined_call_operand.hbm [shape: bf16[128,128], index: 2, kind: input, shape index: {}]   ;;  %s337_s3 = inlined_call_operand.vmem [shape: f32[1,128], index: 3, kind: input, shape index: {}]   ;;  %s338_s4 = inlined_call_operand.vmem [shape: f32[16,4], index: 4, kind: output, shape index: {}]  }
   0x1   :  { %s19_s16 = sshll.u32 %s282_s15, 4  ;;  %s20_s16 = int_to_ptr.vmem [resolvable:$true] %s19_s16 }
   0x2   :  { %s268_s17 = scalar_lea.vmem %s20_s16, 1024  ;;  %p273_p1 = scmp.lt.s32.totalorder %s20_s16, %s20_s16 }
   0x3   :  { %p269_p0 = scmp.ne.s32.totalorder %s20_s16, %s268_s17  ;;  %p274_p2 = scmp.lt.s32.totalorder %s268_s17, %s268_s17 }
   0x5   :  { %p275_p3 = por %p274_p2, %p273_p1 }
   0x7   :  { %p276_p4 = pnand %p275_p3, %p269_p0 }
   0x9   :  { %279 = shalt.err (!%p276_p4)
}
   0xa   :  { %s283_s18 = smov 64   ;;  %s284_s19 = smov 4  }
   0xb   :  { %25 = dma.hbm_to_vmem [thread:$0]  %s336_s2, 1024, %s20_s16, [#allocation3], %s283_s18, %s283_s18, %s284_s19  }
   0xc   :  { %280 = dma.done.wait [#allocation3], 1024  }
   0xd   :  { %281 = vsyncadd [#allocation3], 4294966272  ;;  %v285_v0 = vmov 0   ;;  %v36_v1 = vld [vmem:[%s335_s1] sm:$0xff]  ;;  %v37_v2 = vld [vmem:[%s335_s1 + $0x8] sm:$0xff]  ;;  %v286_v13 = vmov 0.0  }
   0xe   :  { %247 = vset.pattern.permute.xlu0 %v285_v0  ;;  %v209_v3 = vld [vmem:[%s334_s0] sm:$0xff]   ;;  %v248_v12 = vld [vmem:[#allocation2 + $0x38] sm:$0xff]   ;;  %221 = vmatprep.subr.bf16.mxu0 %v286_v13  ;;  %v249_v14 = vld [vmem:[#allocation2 + $0x30] sm:$0xff]   ;;  %vm287_vm0 = vmmov 0   ;;  %vm191_vm1 = vcmask 31744  }
   0xf   :  { %40 = vperm.xlu0 %247, %v36_v1   ;;  %v210_v4 = vunpack.c.l.bf16 %v209_v3  ;;  %v211_v7 = vunpack.c.h.bf16 %v209_v3  ;;  %222 = vmatpush3.bf16.msra.mxu0 %v248_v12  ;;  %v250_v15 = vld [vmem:[#allocation2 + $0x28] sm:$0xff]   ;;  %v251_v16 = vld [vmem:[#allocation2 + $0x20] sm:$0xff]   ;;  %v252_v17 = vld [vmem:[#allocation2 + $0x18] sm:$0xff]  }
  0x10   :  { %223 = vmatprep.subr.bf16.mxu0 %v286_v13  ;;  %237 = vmatprep.mubr.msk.bf16.mxu0 %vm287_vm0, %v286_v13  ;;  %v253_v18 = vld [vmem:[#allocation2 + $0x10] sm:$0xff]   ;;  %v254_v19 = vld [vmem:[#allocation2 + $0x8] sm:$0xff]   ;;  %v255_v20 = vld [vmem:[#allocation2] sm:$0xff]  }
  0x11   :  { %v199_v44 = vld [vmem:[%s337_s3] ss:$0 sm:$0xff] }
  0x13   :  { %45 = vperm.xlu0 %247, %v37_v2   ;;  %224 = vmatpush3.bf16.msra.mxu0 %v249_v14 }
  0x14   :  { %225 = vmatprep.subr.bf16.mxu0 %v286_v13 }
  0x17   :  { %226 = vmatpush3.bf16.msra.mxu0 %v250_v15 }
  0x18   :  { %227 = vmatprep.subr.bf16.mxu0 %v286_v13 }
  0x1b   :  { %228 = vmatpush3.bf16.msra.mxu0 %v251_v16 }
  0x1c   :  { %229 = vmatprep.subr.bf16.mxu0 %v286_v13 }
  0x1f   :  { %230 = vmatpush3.bf16.msra.mxu0 %v252_v17 }
  0x20   :  { %231 = vmatprep.subr.bf16.mxu0 %v286_v13 }
  0x23   :  { %232 = vmatpush3.bf16.msra.mxu0 %v253_v18 }
  0x24   :  { %233 = vmatprep.subr.bf16.mxu0 %v286_v13 }
  0x27   :  { %234 = vmatpush3.bf16.msra.mxu0 %v254_v19 }
  0x28   :  { %235 = vmatprep.subr.bf16.mxu0 %v286_v13 }
  0x2b   :  { %236 = vmatpush3.bf16.msra.mxu0 %v255_v20 }
  0x8a   :  { %v41_v5 = vpop.permute.xlu0 %40 }
  0x8b   :  { %v48_v6 = vmul.f32 %v210_v4, %v41_v5 }
  0x8d   :  { %50 = vadd.xlane.f32.xlu1 %v48_v6  ;;  %v56_v8 = vmul.f32 %v48_v6, %v48_v6 }
  0x8e   :  { %v46_v9 = vpop.permute.xlu0 %45 }
  0x8f   :  { %v49_v10 = vmul.f32 %v211_v7, %v46_v9  ;;  %58 = vadd.xlane.f32.xlu0 %v56_v8 }
  0x91   :  { %52 = vadd.xlane.f32.xlu1 %v49_v10  ;;  %v57_v11 = vmul.f32 %v49_v10, %v49_v10 }
  0x95   :  { %60 = vadd.xlane.f32.xlu1 %v57_v11 }
 0x116   :  { %v51_v21 = vpop.xlane.xlu1 %50 }
 0x117   :  { %v54_v22 = vmul.f32 0.0078125, %v51_v21 }
 0x118   :  { %v59_v23 = vpop.xlane.xlu0 %58 }
 0x119   :  { %v64_v24 = vmul.f32 %v54_v22, %v54_v22  ;;  %v62_v25 = vmul.f32 0.0078125, %v59_v23  ;;  %v70_v38 = vsub.f32 %v48_v6, %v54_v22 }
 0x11a   :  { %v53_v26 = vpop.xlane.xlu1 %52 }
 0x11b   :  { %v66_v27 = vsub.f32 %v62_v25, %v64_v24  ;;  %v55_v28 = vmul.f32 0.0078125, %v53_v26 }
 0x11d   :  { %v68_v29 = vmax.f32 %v66_v27, 0.0  ;;  %v65_v31 = vmul.f32 %v55_v28, %v55_v28  ;;  %v71_v39 = vsub.f32 %v49_v10, %v55_v28 }
 0x11e   :  { %v61_v30 = vpop.xlane.xlu1 %60 }
 0x11f   :  { %v63_v32 = vmul.f32 0.0078125, %v61_v30  ;;  %v72_v33 = vadd.f32 1e-05, %v68_v29 }
 0x121   :  { %v67_v34 = vsub.f32 %v63_v32, %v65_v31  ;;  %256 = vrsqrt.f32 %v72_v33 }
 0x123   :  { %v69_v35 = vmax.f32 %v67_v34, 0.0 }
 0x125   :  { %v73_v36 = vadd.f32 1e-05, %v69_v35 }
 0x127   :  { %258 = vrsqrt.f32 %v73_v36 }
 0x12e   :  { %v257_v37 = vpop.eup %256 }
 0x12f   :  { %v76_v41 = vmul.f32 %v257_v37, %v70_v38 }
 0x134   :  { %v259_v40 = vpop.eup %258 }
 0x135   :  { %v77_v42 = vmul.f32 %v259_v40, %v71_v39 }
 0x137   :  { %v78_v43 = vpack.c.bf16 %v77_v42, %v76_v41 }
 0x139   :  { %238 = vmatmul.mubr.bf16.vlgmr.msra.gmra.mxu0 %v78_v43 }
 0x1f9   :  { %v184_v45 = vpop.f32.mrf.mxu0 }
 0x1fa   :  { %v185_v46 = vadd.f32 %v199_v44, %v184_v45 }
 0x1fb   :  { %v239_v47 = vpop.f32.mrf.mxu0 }
 0x1fc   :  { %192 = vst.msk [vmem:[%s338_s4] sm:$0xff] %vm191_vm1, %v185_v46 }
 0x1fd   :  { %v187_v48 = vpop.f32.mrf.mxu0 }
 0x1fe   :  { %v188_v49 = vadd.f32 %v199_v44, %v187_v48 }
 0x1ff   :  { %v240_v50 = vpop.f32.mrf.mxu0 }
 0x200   :  { %193 = vst.msk [vmem:[%s338_s4 + $0x8] sm:$0xff] %vm191_vm1, %v188_v49 }
 0x201   :  { %198 = vsyncpa [#allocation3], 1 }

</bundles_post_ra>
